<compile_context>
chip_gen: v7x
topology: tpu7x:2x2x1
jax: 0.10.0
libtpu: 0.0.40
codegen_flags: <defaults>
</compile_context>

<pallas_src>
import functools

import jax
import jax.numpy as jnp
from jax import lax
from jax.experimental import pallas as pl
from jax.experimental.pallas import tpu as pltpu

_SUB = 128  # fixed triangular-block width (v5e MXU native; divides every TT)


def _cln_kernel(eps, n_sub, sub, tri_ref, x_ref, g_ref, b_ref, o_ref, carry_ref):
    # tri_ref  : (SUB, SUB) bf16 upper-triangular ones (resident constant)
    # x_ref    : (NB, C, TT) f32 current (batch-subtile, time-tile) block
    # g_ref/b_ref: (C, 1) f32 affine params
    # o_ref    : (NB, C, TT)
    # carry_ref: (2*NB, 1) f32 running totals; rows [0,NB)=cum_sum, [NB,2NB)=cum_pow
    t_blk = pl.program_id(1)

    @pl.when(t_blk == 0)
    def _():
        carry_ref[...] = jnp.zeros_like(carry_ref)

    NB, C, TT = x_ref.shape

    # --- per-time-step channel reductions: one (1, TT) row per batch element ---
    sums, pows = [], []
    for nb in range(NB):
        xn = x_ref[nb]                                          # (C, TT) f32
        sums.append(jnp.sum(xn, axis=0, keepdims=True))         # (1, TT)
        pows.append(jnp.sum(xn * xn, axis=0, keepdims=True))    # (1, TT)
    stacked = jnp.concatenate(sums + pows, axis=0)              # (2*NB, TT) f32

    # Split into exact bf16 hi + bf16 lo so the prefix matmuls run on the
    # native bf16 MXU path with f32 accumulation yet keep ~f32 accuracy.
    hi = stacked.astype(jnp.bfloat16)                           # exact hi part
    lo = (stacked - hi.astype(jnp.float32)).astype(jnp.bfloat16)

    tri = tri_ref[...]                                          # (SUB, SUB) bf16

    # --- blocked inclusive prefix scan along time (SUB-wide lane chunks) ---
    running = carry_ref[...]                                    # (2*NB, 1) f32
    pieces = []
    for j in range(n_sub):                                      # n_sub <= TT/128, static
        s0, s1 = j * sub, (j + 1) * sub
        local = jnp.dot(hi[:, s0:s1], tri, preferred_element_type=jnp.float32)
        local = local + jnp.dot(lo[:, s0:s1], tri, preferred_element_type=jnp.float32)
        cum_j = local + running                                 # (2*NB, SUB)
        running = cum_j[:, sub - 1:sub]                         # carry = last prefix column
        pieces.append(cum_j)
    carry_ref[...] = running
    cum = pieces[0] if n_sub == 1 else jnp.concatenate(pieces, axis=1)  # (2*NB, TT)

    # --- cumulative statistics ---
    cum_sum = cum[:NB, :]                                       # (NB, TT)
    cum_pow = cum[NB:, :]                                       # (NB, TT)

    base = (t_blk * TT).astype(jnp.float32)
    t_idx = lax.broadcasted_iota(jnp.int32, (1, TT), 1).astype(jnp.float32)
    inv_cnt = 1.0 / (float(C) * (base + t_idx + 1.0))           # (1, TT): one row divide

    cum_mean = cum_sum * inv_cnt                                # (NB, TT)
    cum_var = (cum_pow - 2.0 * cum_mean * cum_sum) * inv_cnt + cum_mean * cum_mean
    inv_std = lax.rsqrt(cum_var + eps)                          # (NB, TT) EUP rsqrt

    # --- normalize + affine; re-read x from VMEM (keeps the big tile off vregs) ---
    g = g_ref[...]                                              # (C, 1)
    b = b_ref[...]
    for nb in range(NB):
        mean_nb = cum_mean[nb:nb + 1, :]                        # (1, TT)
        istd_nb = inv_std[nb:nb + 1, :]                         # (1, TT)
        y = (x_ref[nb] - mean_nb) * istd_nb                     # (C, TT) sublane bcast
        o_ref[nb] = (y * g + b).astype(o_ref.dtype)             # (C, 1) affine, lane-dense store


def _round_up(v, m):
    return ((v + m - 1) // m) * m


def _pick_batch_tile(B, C, TT, target_bytes):
    """Largest divisor of B (<= 8) that keeps the block under target_bytes and
    leaves >= 2 parallel batch grid steps (v7x megacore)."""
    per = C * TT * 4                       # f32 bytes per batch element per time tile
    best = 1
    for nb in range(1, min(B, 8) + 1):
        if B % nb:
            continue
        if nb > 1 and B // nb < 2:
            continue
        if nb > 1 and nb * per > target_bytes:
            continue
        best = nb
    return best


def _vmem_limit_bytes(NB, C, TT, sub):
    f32, bf16 = 4, 2
    x_blk = NB * C * TT * f32
    need = 2 * 2 * x_blk                   # double-buffered input + output tiles
    need += 2 * sub * sub * bf16           # resident triangular block (2 bufs worst case)
    need += 2 * 2 * 2 * C * f32            # gain / bias blocks
    need += 2 * NB * 128 * f32             # carry scratch (lane-padded)
    need += 4 << 20                        # scan temporaries + compiler slack
    return int(min(max(2 * need, 16 << 20), 48 << 20))   # headroom below v7x 64 MiB VMEM


def cumulative_layer_norm_1d(x, gain, bias, eps=1e-5, time_tile=1024,
                             target_block_bytes=512 * 1024):
    """x: (B, C, T) float32; gain/bias: (1, C, 1) float32."""
    B, C, T = x.shape
    assert gain.shape == (1, C, 1) and bias.shape == (1, C, 1)
    x = x.astype(jnp.float32)
    gain = gain.astype(jnp.float32)
    bias = bias.astype(jnp.float32)

    # Time tiling: lane-aligned (multiple of 128), capped at `time_tile`; pad T
    # instead of asserting divisibility (padding is causal-safe, sliced off below).
    TT = _round_up(min(max(int(time_tile), 128), _round_up(T, 128)), 128)
    T_pad = _round_up(T, TT)
    n_t = T_pad // TT
    if T_pad != T:
        x = jnp.pad(x, ((0, 0), (0, 0), (0, T_pad - T)))

    sub = min(_SUB, TT)
    n_sub = TT // sub

    NB = _pick_batch_tile(B, C, TT, target_block_bytes)
    grid = (B // NB, n_t)

    # Fixed-size within-chunk triangular constant: tri[u, t] = 1 if u <= t.
    idx = jnp.arange(sub, dtype=jnp.int32)
    tri = (idx[:, None] <= idx[None, :]).astype(jnp.bfloat16)   # (sub, sub), exact in bf16

    kernel = functools.partial(_cln_kernel, float(eps), n_sub, sub)

    out = pl.pallas_call(
        kernel,
        out_shape=jax.ShapeDtypeStruct((B, C, T_pad), x.dtype),
        grid_spec=pltpu.PrefetchScalarGridSpec(
            num_scalar_prefetch=0,
            grid=grid,
            in_specs=[
                pl.BlockSpec((sub, sub), lambda b, t: (0, 0)),        # tri (stays resident)
                pl.BlockSpec((NB, C, TT), lambda b, t: (b, 0, t)),    # x block
                pl.BlockSpec((None, C, 1), lambda b, t: (0, 0, 0)),   # gain (2-D ref)
                pl.BlockSpec((None, C, 1), lambda b, t: (0, 0, 0)),   # bias (2-D ref)
            ],
            out_specs=pl.BlockSpec((NB, C, TT), lambda b, t: (b, 0, t)),
            scratch_shapes=[pltpu.VMEM((2 * NB, 1), jnp.float32)],    # running [sum; pow]
        ),
        compiler_params=pltpu.CompilerParams(
            dimension_semantics=("parallel", "arbitrary"),
            vmem_limit_bytes=_vmem_limit_bytes(NB, C, TT, sub),
        ),
    )(tri, x, gain, bias)

    return out[:, :, :T] if T_pad != T else out


def _reference(x, gain, bias, eps=1e-5):
    # Pure-JAX reference mirroring the PyTorch forward exactly.
    B, C, T = x.shape
    cum_sum = jnp.cumsum(x.sum(axis=1), axis=1)                 # (B, T)
    cum_pow = jnp.cumsum((x ** 2).sum(axis=1), axis=1)          # (B, T)
    entry_cnt = jnp.arange(C, C * (T + 1), C, dtype=x.dtype)[None, :]
    cum_mean = cum_sum / entry_cnt
    cum_var = (cum_pow - 2 * cum_mean * cum_sum) / entry_cnt + cum_mean ** 2
    cum_std = jnp.sqrt(cum_var + eps)
    y = (x - cum_mean[:, None, :]) / cum_std[:, None, :]
    return y * gain + bias


def _run_case(key, B, C, T, time_tile):
    kx, kg, kb = jax.random.split(key, 3)
    x = jax.random.normal(kx, (B, C, T), dtype=jnp.float32)
    gain = jnp.ones((1, C, 1), jnp.float32) + 0.1 * jax.random.normal(kg, (1, C, 1), jnp.float32)
    bias = 0.1 * jax.random.normal(kb, (1, C, 1), jnp.float32)

    out = cumulative_layer_norm_1d(x, gain, bias, eps=1e-5, time_tile=time_tile)
    out = jax.block_until_ready(out)
    ref = _reference(x, gain, bias, eps=1e-5)

    assert out.shape == (B, C, T)
    # Split-bf16 scan keeps errors well below 1e-4 on unit-scale normalized outputs.
    assert jnp.allclose(out, ref, atol=1e-4, rtol=1e-4), f"mismatch vs reference ({B},{C},{T})"


if __name__ == "__main__":
    key = jax.random.PRNGKey(0)
    k1, k2, k3 = jax.random.split(key, 3)

    # Small demo shape from the module (batch, num_features, seq_len): single
    # lane-aligned time tile (T=16 padded to 128).
    _run_case(k1, B=2, C=4, T=16, time_tile=1024)
    # Multi-tile path: exercises the cross-tile cum_sum / cum_pow carry.
    _run_case(k2, B=2, C=8, T=256, time_tile=128)
    # Batch sub-tile (NB=2), non-128-divisible T (padded), and the carry path.
    _run_case(k3, B=4, C=4, T=200, time_tile=128)

    print("KERNEL_OK")
</pallas_src>

<mosaic_0001>
module attributes {stable_mosaic.version = 11 : i64} {
  func.func @_cln_kernel(%arg0: i32, %arg1: i32, %arg2: memref<128x128xbf16, #tpu.memory_space<vmem>>, %arg3: memref<1x4x128xf32, #tpu.memory_space<vmem>>, %arg4: memref<1x4x1xf32, #tpu.memory_space<vmem>>, %arg5: memref<1x4x1xf32, #tpu.memory_space<vmem>>, %arg6: memref<1x4x128xf32, #tpu.memory_space<vmem>>, %arg7: memref<2x1xf32, #tpu.memory_space<vmem>>) attributes {dimension_semantics = [#tpu.dimension_semantics<parallel>, #tpu.dimension_semantics<arbitrary>], iteration_bounds = array<i64: 2, 1>, scalar_prefetch = 0 : i64, scratch_operands = 1 : i64, tpu.core_type = #tpu.core_type<tc>, window_params = [{pipeline_mode = #tpu.pipeline_mode<synchronous>, transform_indices = @transform_0, window_bounds = array<i64: 128, 128>}, {transform_indices = @transform_1, window_bounds = array<i64: 1, 4, 128>}, {pipeline_mode = #tpu.pipeline_mode<synchronous>, transform_indices = @transform_2, window_bounds = array<i64: 1, 4, 1>}, {pipeline_mode = #tpu.pipeline_mode<synchronous>, transform_indices = @transform_3, window_bounds = array<i64: 1, 4, 1>}, {transform_indices = @transform_4, window_bounds = array<i64: 1, 4, 128>}]} {
    %c0_i32 = arith.constant 0 : i32
    %0 = arith.cmpi eq, %arg1, %c0_i32 : i32
    %1 = arith.extui %0 : i1 to i32
    %c0_i32_0 = arith.constant 0 : i32
    %2 = arith.cmpi ne, %1, %c0_i32_0 : i32
    scf.if %2 {
      %cst_29 = arith.constant 0.000000e+00 : f32
      %66 = vector.broadcast %cst_29 : f32 to vector<2x1xf32>
      %c0_30 = arith.constant 0 : index
      %c0_31 = arith.constant 0 : index
      %67 = vector.load %arg7[%c0_30, %c0_31] : memref<2x1xf32, #tpu.memory_space<vmem>>, vector<2x1xf32>
      tpu.vector_store %arg7[%c0_30, %c0_31], %66 {strides = array<i32>} : memref<2x1xf32, #tpu.memory_space<vmem>>, vector<2x1xf32>,
    } else {
    }
    %c0 = arith.constant 0 : index
    %c0_1 = arith.constant 0 : index
    %c0_2 = arith.constant 0 : index
    %3 = vector.load %arg3[%c0, %c0_1, %c0_2] : memref<1x4x128xf32, #tpu.memory_space<vmem>>, vector<1x4x128xf32>
    %4 = vector.shape_cast %3 : vector<1x4x128xf32> to vector<4x128xf32>
    %cst = arith.constant dense<0.000000e+00> : vector<128xf32>
    %5 = vector.multi_reduction <add>, %4, %cst [0] : vector<4x128xf32> to vector<128xf32>
    %6 = vector.shape_cast %5 : vector<128xf32> to vector<1x128xf32>
    %7 = arith.mulf %4, %4 : vector<4x128xf32>
    %cst_3 = arith.constant dense<0.000000e+00> : vector<128xf32>
    %8 = vector.multi_reduction <add>, %7, %cst_3 [0] : vector<4x128xf32> to vector<128xf32>
    %9 = vector.shape_cast %8 : vector<128xf32> to vector<1x128xf32>
    %10 = tpu.concatenate %6, %9 in 0 : vector<1x128xf32>, vector<1x128xf32> -> vector<2x128xf32>
    %11 = arith.truncf %10 : vector<2x128xf32> to vector<2x128xbf16>
    %12 = arith.extf %11 : vector<2x128xbf16> to vector<2x128xf32>
    %13 = arith.subf %10, %12 : vector<2x128xf32>
    %14 = arith.truncf %13 : vector<2x128xf32> to vector<2x128xbf16>
    %c0_4 = arith.constant 0 : index
    %c0_5 = arith.constant 0 : index
    %15 = vector.load %arg2[%c0_4, %c0_5] : memref<128x128xbf16, #tpu.memory_space<vmem>>, vector<128x128xbf16>
    %c0_6 = arith.constant 0 : index
    %c0_7 = arith.constant 0 : index
    %16 = vector.load %arg7[%c0_6, %c0_7] : memref<2x1xf32, #tpu.memory_space<vmem>>, vector<2x1xf32>
    %cst_8 = arith.constant dense<0.000000e+00> : vector<2x128xf32>
    %17 = tpu.matmul %11, %15, %cst_8 {dimension_numbers = #tpu.dot_dimension_numbers<[1], [0], [0], [1], [0, 0, 1, 1], [], []>} : vector<2x128xbf16>, vector<128x128xbf16>, vector<2x128xf32> -> vector<2x128xf32>
    %cst_9 = arith.constant dense<0.000000e+00> : vector<2x128xf32>
    %18 = tpu.matmul %14, %15, %cst_9 {dimension_numbers = #tpu.dot_dimension_numbers<[1], [0], [0], [1], [0, 0, 1, 1], [], []>} : vector<2x128xbf16>, vector<128x128xbf16>, vector<2x128xf32> -> vector<2x128xf32>
    %19 = arith.addf %17, %18 : vector<2x128xf32>
    %20 = vector.broadcast %16 : vector<2x1xf32> to vector<2x128xf32>
    %21 = arith.addf %19, %20 : vector<2x128xf32>
    %22 = vector.extract_strided_slice %21 {offsets = [0, 127], sizes = [2, 1], strides = [1, 1]} : vector<2x128xf32> to vector<2x1xf32>
    %c0_10 = arith.constant 0 : index
    %c0_11 = arith.constant 0 : index
    %23 = vector.load %arg7[%c0_10, %c0_11] : memref<2x1xf32, #tpu.memory_space<vmem>>, vector<2x1xf32>
    tpu.vector_store %arg7[%c0_10, %c0_11], %22 {strides = array<i32>} : memref<2x1xf32, #tpu.memory_space<vmem>>, vector<2x1xf32>,
    %24 = vector.extract_strided_slice %21 {offsets = [0, 0], sizes = [1, 128], strides = [1, 1]} : vector<2x128xf32> to vector<1x128xf32>
    %25 = vector.extract_strided_slice %21 {offsets = [1, 0], sizes = [1, 128], strides = [1, 1]} : vector<2x128xf32> to vector<1x128xf32>
    %c128_i32 = arith.constant 128 : i32
    %26 = arith.muli %arg1, %c128_i32 : i32
    %27 = arith.sitofp %26 : i32 to f32
    %28 = tpu.iota {dimensions = array<i32: 1>} : vector<1x128xi32>
    %29 = arith.sitofp %28 : vector<1x128xi32> to vector<1x128xf32>
    %30 = vector.broadcast %27 : f32 to vector<1x128xf32>
    %31 = arith.addf %30, %29 : vector<1x128xf32>
    %cst_12 = arith.constant 1.000000e+00 : f32
    %32 = vector.broadcast %cst_12 : f32 to vector<1x128xf32>
    %33 = arith.addf %31, %32 : vector<1x128xf32>
    %cst_13 = arith.constant 4.000000e+00 : f32
    %34 = vector.broadcast %cst_13 : f32 to vector<1x128xf32>
    %35 = arith.mulf %34, %33 : vector<1x128xf32>
    %cst_14 = arith.constant 1.000000e+00 : f32
    %36 = vector.broadcast %cst_14 : f32 to vector<1x128xf32>
    %37 = arith.divf %36, %35 : vector<1x128xf32>
    %38 = arith.mulf %24, %37 : vector<1x128xf32>
    %cst_15 = arith.constant 2.000000e+00 : f32
    %39 = vector.broadcast %cst_15 : f32 to vector<1x128xf32>
    %40 = arith.mulf %39, %38 : vector<1x128xf32>
    %41 = arith.mulf %40, %24 : vector<1x128xf32>
    %42 = arith.subf %25, %41 : vector<1x128xf32>
    %43 = arith.mulf %42, %37 : vector<1x128xf32>
    %44 = arith.mulf %38, %38 : vector<1x128xf32>
    %45 = arith.addf %43, %44 : vector<1x128xf32>
    %cst_16 = arith.constant 9.99999974E-6 : f32
    %46 = vector.broadcast %cst_16 : f32 to vector<1x128xf32>
    %47 = arith.addf %45, %46 : vector<1x128xf32>
    %48 = math.rsqrt %47 : vector<1x128xf32>
    %c0_17 = arith.constant 0 : index
    %c0_18 = arith.constant 0 : index
    %c0_19 = arith.constant 0 : index
    %49 = vector.load %arg4[%c0_17, %c0_18, %c0_19] : memref<1x4x1xf32, #tpu.memory_space<vmem>>, vector<1x4x1xf32>
    %50 = vector.shape_cast %49 : vector<1x4x1xf32> to vector<4x1xf32>
    %c0_20 = arith.constant 0 : index
    %c0_21 = arith.constant 0 : index
    %c0_22 = arith.constant 0 : index
    %51 = vector.load %arg5[%c0_20, %c0_21, %c0_22] : memref<1x4x1xf32, #tpu.memory_space<vmem>>, vector<1x4x1xf32>
    %52 = vector.shape_cast %51 : vector<1x4x1xf32> to vector<4x1xf32>
    %c0_23 = arith.constant 0 : index
    %c0_24 = arith.constant 0 : index
    %c0_25 = arith.constant 0 : index
    %53 = vector.load %arg3[%c0_23, %c0_24, %c0_25] : memref<1x4x128xf32, #tpu.memory_space<vmem>>, vector<1x4x128xf32>
    %54 = vector.shape_cast %53 : vector<1x4x128xf32> to vector<4x128xf32>
    %55 = vector.broadcast %38 : vector<1x128xf32> to vector<4x128xf32>
    %56 = arith.subf %54, %55 : vector<4x128xf32>
    %57 = vector.broadcast %48 : vector<1x128xf32> to vector<4x128xf32>
    %58 = arith.mulf %56, %57 : vector<4x128xf32>
    %59 = vector.broadcast %50 : vector<4x1xf32> to vector<4x128xf32>
    %60 = arith.mulf %58, %59 : vector<4x128xf32>
    %61 = vector.broadcast %52 : vector<4x1xf32> to vector<4x128xf32>
    %62 = arith.addf %60, %61 : vector<4x128xf32>
    %c0_26 = arith.constant 0 : index
    %c0_27 = arith.constant 0 : index
    %c0_28 = arith.constant 0 : index
    %63 = vector.load %arg6[%c0_26, %c0_27, %c0_28] : memref<1x4x128xf32, #tpu.memory_space<vmem>>, vector<1x4x128xf32>
    %64 = vector.shape_cast %63 : vector<1x4x128xf32> to vector<4x128xf32>
    %65 = vector.shape_cast %62 : vector<4x128xf32> to vector<1x4x128xf32>
    tpu.vector_store %arg6[%c0_26, %c0_27, %c0_28], %65 {strides = array<i32>} : memref<1x4x128xf32, #tpu.memory_space<vmem>>, vector<1x4x128xf32>,
    return
  }
  func.func @transform_0(%arg0: i32, %arg1: i32) -> (i32, i32) {
    %c0_i32 = arith.constant 0 : i32
    %c0_i32_0 = arith.constant 0 : i32
    %c0_i32_1 = arith.constant 0 : i32
    return %c0_i32, %c0_i32_0 : i32, i32
  }
  func.func @transform_1(%arg0: i32, %arg1: i32) -> (i32, i32, i32) {
    %c0_i32 = arith.constant 0 : i32
    %c0_i32_0 = arith.constant 0 : i32
    return %arg0, %c0_i32, %arg1 : i32, i32, i32
  }
  func.func @transform_2(%arg0: i32, %arg1: i32) -> (i32, i32, i32) {
    %c0_i32 = arith.constant 0 : i32
    %c0_i32_0 = arith.constant 0 : i32
    %c0_i32_1 = arith.constant 0 : i32
    %c0_i32_2 = arith.constant 0 : i32
    return %c0_i32, %c0_i32_0, %c0_i32_1 : i32, i32, i32
  }
  func.func @transform_3(%arg0: i32, %arg1: i32) -> (i32, i32, i32) {
    %c0_i32 = arith.constant 0 : i32
    %c0_i32_0 = arith.constant 0 : i32
    %c0_i32_1 = arith.constant 0 : i32
    %c0_i32_2 = arith.constant 0 : i32
    return %c0_i32, %c0_i32_0, %c0_i32_1 : i32, i32, i32
  }
  func.func @transform_4(%arg0: i32, %arg1: i32) -> (i32, i32, i32) {
    %c0_i32 = arith.constant 0 : i32
    %c0_i32_0 = arith.constant 0 : i32
    return %arg0, %c0_i32, %arg1 : i32, i32, i32
  }
}

</mosaic_0001>

<bundles_post_ra>
// kernel: tpu_custom_call.1
= control target key start
LH: loop header
LB: loop body
LE: loop exit
PB: predicated region body
PF: predicated region fallthrough
CT: control target
= control target key end

     0   :  { %9 = vsyncpa [#allocation4], 0  ;;  %s1063_s0 = inlined_call_operand.hbm [shape: bf16[128,128], index: 0, kind: input, shape index: {}]   ;;  %s1064_s1 = inlined_call_operand.vmem [shape: f32[2,4,128], index: 1, kind: input, shape index: {}]   ;;  %s1065_s2 = inlined_call_operand.vmem [shape: f32[1,4,1], index: 2, kind: input, shape index: {}]   ;;  %s1066_s3 = inlined_call_operand.vmem [shape: f32[1,4,1], index: 3, kind: input, shape index: {}]   ;;  %s1067_s4 = inlined_call_operand.hbm [shape: f32[2,4,128], index: 4, kind: output, shape index: {}]  }
   0x1   :  { %10 = vsyncpa [#allocation5], 0 }
   0x2   :  { %12 = vsyncpa [#allocation5 + $0x1], 0  ;;  %s880_s15 = smov 0   ;;  %s882_s16 = smov 0  }
   0x3   :  { %s884_s17 = smov 0   ;;  %s886_s18 = smov 0  }
   0x4   :  { %s888_s19 = smov 0   ;;  %s890_s20 = smov 0  }
   0x5 LB: > { %s570_s21 = sadd.s32 4294967295, %s845_s20   ;;  %s571_s22 = sadd.s32 4294967294, %s845_s20   ;;  %s845_s20 = sphi %s890_s20, %s18_s20   ;;  %s841_s19 = sphi %s888_s19, %s1085_s19   ;;  %s837_s18 = sphi %s886_s18, %s1084_s18   ;;  %s833_s17 = sphi %s884_s17, %s1083_s17   ;;  %s829_s16 = sphi %s882_s16, %s1082_s16   ;;  %s825_s15 = sphi %s880_s15, %s1081_s15  }
   0x6   : > { %s30_s23 = sadd.s32 1, %s841_s19  ;;  %s130_s24 = sadd.s32 1, %s833_s17 }
   0x7   : > { %p32_p0 = scmp.ge.s32.totalorder %s30_s23, 2  ;;  %p140_p1 = scmp.ne.s32.totalorder %s833_s17, %s829_s16 }
   0x8   : > { %p141_p2 = scmp.eq.s32.totalorder %s570_s21, 1  ;;  %p146_p3 = scmp.ne.s32.totalorder %s829_s16, %s825_s15 }
   0x9   : > { %s1087_s23 = smov (%p32_p0, %s30_s23), 0  ;;  %p147_p5 = scmp.eq.s32.totalorder %s571_s22, 1 }
   0xa   : > { %p920_p4 = por %p141_p2, %p140_p1  ;;  %s125_s26 = ssub.s32 %s841_s19, %s1087_s23 }
   0xb   : > { %p572_p6 = scmp.ge.s32.totalorder %s845_s20, 1  ;;  %p128_p7 = scmp.eq.s32.totalorder %s125_s26, 0 }
   0xc   : > { %s1072_s25 = scalar_select %p920_p4, 1, 0 }
   0xd   : > { %p927_p8 = por %p147_p5, %p146_p3  ;;  %p154_p9 = scmp.lt.s32.totalorder %s845_s20, 3 }
   0xe   : > { %s933_s28 = scalar_select %p128_p7, %s833_s17, %s130_s24  }
   0xf   : > { %s1073_s27 = scalar_select %p927_p8, 1, 0 }
  0x10   : > { %p935_p10 = pnand %p572_p6, %p154_p9  ;;  %p939_p11 = scmp.eq.s32.totalorder %s570_s21, 0 }
  0x11   : > { %s847_s5 = smov [#allocation3]   ;;  %s735_s10 = scalar_lea.hbm %s1063_s0, 1024 }
  0x12   : > { %s1074_s29 = scalar_select %p935_p10, 1, 0 }
  0x13   : > { %s1075_s30 = scalar_select %p939_p11, 1, 0 }
  0x14   : > { %p655_p12 = pneg %p935_p10  ;;  %s166_s6 = sshll.u32 %s847_s5, 4  ;;  %s167_s6 = int_to_ptr.vmem [resolvable:$true] %s166_s6 }
  0x15   : > { %p736_p0 = scmp.ne.s32.totalorder %s1063_s0, %s735_s10  ;;  %p742_p5 = scmp.lt.u32.totalorder %s735_s10, %s1063_s0 }
  0x16   : > { %p947_p13 = pnand %p939_p11, %p655_p12 }
  0x18   : > { %p737_p1 = pneg %p947_p13 }
  0x1a   : > { %p738_p2 = pnand %p737_p1, %p736_p0 }
  0x1c   : > { %p739_p3 = pneg %p738_p2 }
  0x1e   : > { %p744_p6 = pnand %p742_p5, %p739_p3 }
  0x20   : > { %747 = shalt.err (!%p744_p6)
}
  0x21   : > { %s748_s21 = scalar_lea.vmem %s167_s6, 1024  ;;  %p756_p8 = scmp.lt.s32.totalorder %s167_s6, %s167_s6 }
  0x22   : > { %p749_p7 = scmp.ne.s32.totalorder %s167_s6, %s748_s21  ;;  %p757_p4 = scmp.lt.s32.totalorder %s748_s21, %s748_s21 }
  0x24   : > { %p751_p9 = pnand %p749_p7, %p737_p1  ;;  %p758_p11 = por %p757_p4, %p756_p8 }
  0x26   : > { %p752_p12 = pneg %p751_p9 }
  0x28   : > { %p759_p10 = pnand %p758_p11, %p752_p12 }
  0x2a   : > { %762 = shalt.err (!%p759_p10)
}
  0x2b   : > { %s848_s22 = smov 64   ;;  %s849_s24 = smov 4  }
  0x2c   : > { %658 = dma.hbm_to_vmem [thread:$0]  (!%p947_p13), %s1063_s0, 1024, %s167_s6, [#allocation4], %s848_s22, %s848_s22, %s849_s24  }
  0x2d   : > { %p1077_p0 = scmp.ne.s32.totalorder %s1074_s29, 0 }
  0x2e   : > { %p1078_p2 = scmp.ne.s32.totalorder (!%p1077_p0), %s1075_s30, 0 }
  0x2f   : > { %198 = sbr.rel (%p1077_p0) target bundleno = 422 (0x1a6), region = 36 }
  0x36   : > { %816 = dma.done.wait (%p1078_p2), [#allocation4], 1024  }
  0x37   : > { %818 = vsyncadd (%p1078_p2), [#allocation4], 4294966272  ;;  %v850_v0 = vmov 0.0   ;;  %p226_p4 = scmp.lt.s32.totalorder %s837_s18, 1  ;;  %vm238_vm0 = vcmask 1024   ;;  %vm851_vm1 = vmmov 0   ;;  %v422_v34 = vlaneseq }
  0x38   : > { %609 = vmatprep.subr.bf16.mxu0 %v850_v0  ;;  %629 = vmatprep.subr.bf16.mxu1 %v850_v0  ;;  %239 = vst.msk [vmem:[#allocation2] sm:$0x3] %vm238_vm0, %v850_v0  ;;  %v852_v1 = vmov 0   ;;  %v723_v2 = vld [vmem:[#allocation3] sm:$0xff]   ;;  %v724_v3 = vld [vmem:[#allocation3 + $0x8] sm:$0xff]   ;;  %v725_v4 = vld [vmem:[#allocation3 + $0x10] sm:$0xff]  }
  0x39   : > { %625 = vmatprep.mubr.msk.bf16.mxu0 %vm851_vm1, %v850_v0  ;;  %645 = vmatprep.mubr.msk.bf16.mxu1 %vm851_vm1, %v850_v0  ;;  %s227_s29 = scalar_select %p226_p4, %s837_s18, 1  ;;  %vm241_vm2 = vcmask 1043456   ;;  %v447_v9 = vld [vmem:[%s1066_s3] sm:$0xf]  ;;  %v728_v21 = vld [vmem:[#allocation3 + $0x28] sm:$0xff]   ;;  %vm257_vm3 = vcmask 1040384  }
  0x3a   : > { %721 = vset.pattern.permute.xlu0 %v852_v1  ;;  %722 = vset.pattern.permute.xlu1 %v852_v1  ;;  %v726_v10 = vld [vmem:[#allocation3 + $0x18] sm:$0xff]   ;;  %v727_v16 = vld [vmem:[#allocation3 + $0x20] sm:$0xff]   ;;  %v729_v26 = vld [vmem:[#allocation3 + $0x30] sm:$0xff]   ;;  %v423_v35 = vand.u32 127, %v422_v34  ;;  %s853_s13 = smov 1   ;;  %v450_v61 = vshrl.u32 %v422_v34, 7 }
  0x3b   : > { %610 = vmatpush3.bf16.msra.mxu0 %v723_v2  ;;  %630 = vmatpush3.bf16.msra.mxu1 %v723_v2  ;;  %s578_s30 = sshll.u32 %s227_s29, 2  ;;  %v446_v12 = vld [vmem:[%s1065_s2] sm:$0xf]  ;;  %s223_s14 = sand.u32 1, %s829_s16  }
  0x3c   : > { %611 = vmatprep.subr.bf16.mxu0 %v850_v0  ;;  %631 = vmatprep.subr.bf16.mxu1 %v850_v0  ;;  %s986_s8 = scalar_lea.vmem %s1064_s1, %s578_s30  ;;  %v730_v30 = vld [vmem:[#allocation3 + $0x38] sm:$0xff]   ;;  %v424_v36 = vcvt.s32.f32 %v423_v35  ;;  %v451_v62 = vsub.s32 0, %v450_v61  ;;  %s577_s21 = sshll.u32 %s223_s14, 2 }
  0x3d   : > { %v240_v5 = vld [vmem:[%s986_s8] sm:$0xf]  ;;  %467 = vperm.xlu1 %722, %v447_v9   ;;  %s588_s22 = sshll.u32 %s837_s18, 6  ;;  %s225_s24 = scalar_lea.vmem [#allocation6], %s577_s21 }
  0x3e   : > { %v242_v7 = vsel %vm241_vm2, %v240_v5, 0.0  ;;  %v249_v8 = vmul.f32 %v240_v5, %v240_v5  ;;  %v427_v37 = vadd.f32 1.0, %v424_v36  ;;  %v448_v1 = vld [vmem:[%s986_s8] sm:$0xf]  ;;  %s487_s26 = sshll.u32 %s225_s24, 4  ;;  %s1015_s30 = scalar_lea.hbm %s1067_s4, %s588_s22  ;;  %s1017_s26 = int_to_ptr.vmem [resolvable:$true] %s487_s26 }
  0x3f   : > { %612 = vmatpush3.bf16.msra.mxu0 %v724_v3  ;;  %632 = vmatpush3.bf16.msra.mxu1 %v724_v3  ;;  %v279_v6 = vld [vmem:[#allocation2] sm:$0x3]  ;;  %v243_v11 = vrot.slane %v242_v7, 4  ;;  %s473_s6 = scalar_lea.sflag [#allocation5], %s223_s14  ;;  %s763_s7 = scalar_lea.vmem %s1017_s26, 64 }
  0x40   : > { %613 = vmatprep.subr.bf16.mxu0 %v850_v0  ;;  %633 = vmatprep.subr.bf16.mxu1 %v850_v0  ;;  %v250_v13 = vsel %vm241_vm2, %v249_v8, 0.0  ;;  %v428_v38 = vmul.f32 4.0, %v427_v37  ;;  %p764_p8 = scmp.ne.s32.totalorder %s1017_s26, %s763_s7  ;;  %p1079_p10 = scmp.ne.s32.totalorder %s1072_s25, 0 }
  0x41   : > { %410 = vperm.xlu0 %721, %v279_v6   ;;  %v244_v14 = vadd.f32 %v243_v11, %v242_v7  ;;  %v251_v15 = vrot.slane %v250_v13, 4  ;;  %s854_s18 = smov [#allocation6]  }
  0x42   : > { %731 = vrcp.f32 %v428_v38  ;;  %p765_p11 = pnand %p764_p8, %p1079_p10  ;;  %s767_s8 = sshll.u32 %s854_s18, 4  ;;  %s768_s8 = int_to_ptr.vmem [resolvable:$false] %s767_s8 }
  0x43   : > { %614 = vmatpush3.bf16.msra.mxu0 %v725_v4  ;;  %634 = vmatpush3.bf16.msra.mxu1 %v725_v4  ;;  %v245_v17 = vrot.slane %v244_v14, 2  ;;  %v252_v18 = vadd.f32 %v251_v15, %v250_v13  ;;  %s769_s9 = scalar_lea.vmem %s768_s8, 128  ;;  %p770_p1 = scmp.lt.s32.totalorder %s1017_s26, %s768_s8 }
  0x44   : > { %615 = vmatprep.subr.bf16.mxu0 %v850_v0  ;;  %635 = vmatprep.subr.bf16.mxu1 %v850_v0  ;;  %p766_p13 = pneg %p765_p11  ;;  %p771_p3 = scmp.lt.s32.totalorder %s769_s9, %s763_s7 }
  0x45   : > { %461 = vperm.xlu0 %721, %v446_v12   ;;  %v246_v19 = vadd.f32 %v245_v17, %v244_v14  ;;  %v253_v20 = vrot.slane %v252_v18, 2 }
  0x46   : > { %p772_p5 = por %p771_p3, %p770_p1 }
  0x47   : > { %616 = vmatpush3.bf16.msra.mxu0 %v726_v10  ;;  %636 = vmatpush3.bf16.msra.mxu1 %v726_v10  ;;  %v247_v22 = vrot.slane %v246_v19, 1  ;;  %v254_v23 = vadd.f32 %v253_v20, %v252_v18 }
  0x48   : > { %617 = vmatprep.subr.bf16.mxu0 %v850_v0  ;;  %637 = vmatprep.subr.bf16.mxu1 %v850_v0  ;;  %p773_p6 = pnand %p772_p5, %p766_p13 }
  0x49   : > { %v248_v24 = vadd.f32 %v247_v22, %v246_v19  ;;  %v255_v25 = vrot.slane %v254_v23, 1 }
  0x4b   : > { %618 = vmatpush3.bf16.msra.mxu0 %v727_v16  ;;  %638 = vmatpush3.bf16.msra.mxu1 %v727_v16  ;;  %v256_v27 = vadd.f32 %v255_v25, %v254_v23 }
  0x4c   : > { %619 = vmatprep.subr.bf16.mxu0 %v850_v0  ;;  %639 = vmatprep.subr.bf16.mxu1 %v850_v0  ;;  %v732_v45 = vpop.eup %731 }
  0x4d   : > { %v258_v28 = vsel %vm257_vm3, %v248_v24, %v256_v27 }
  0x4e   : > { %v259_v29 = vpack.c.bf16 %v258_v28, %v258_v28 }
  0x4f   : > { %620 = vmatpush3.bf16.msra.mxu0 %v728_v21  ;;  %640 = vmatpush3.bf16.msra.mxu1 %v728_v21 }
  0x50   : > { %621 = vmatprep.subr.bf16.mxu0 %v850_v0  ;;  %641 = vmatprep.subr.bf16.mxu1 %v850_v0  ;;  %v260_v31 = vunpack.c.l.bf16 %v259_v29 }
  0x52   : > { %v261_v32 = vsub.f32 %v258_v28, %v260_v31 }
  0x53   : > { %622 = vmatpush3.bf16.msra.mxu0 %v729_v26  ;;  %642 = vmatpush3.bf16.msra.mxu1 %v729_v26 }
  0x54   : > { %623 = vmatprep.subr.bf16.mxu0 %v850_v0  ;;  %643 = vmatprep.subr.bf16.mxu1 %v850_v0  ;;  %v262_v33 = vpack.c.bf16 %v261_v32, %v261_v32  ;;  %v456_v0 = vsub.s32 1, %v450_v61 }
  0x57   : > { %624 = vmatpush3.bf16.msra.mxu0 %v730_v30  ;;  %644 = vmatpush3.bf16.msra.mxu1 %v730_v30 }
  0x5a   : > { %626 = vmatmul.mubr.bf16.vlgmr.msra.gmra.mrb[0].mxu0 %v262_v33  ;;  %646 = vmatmul.mubr.bf16.vlgmr.msra.gmra.mrb[0].mxu1 %v259_v29 }
  0xbc   : > { %v468_v7 = vpop.permute.xlu1 %467 }
  0xc0   : > { %v411_v39 = vpop.permute.xlu0 %410 }
  0xc4   : > { %v462_v6 = vpop.permute.xlu0 %461 }
 0x12d   : > { %v362_v40 = vpop.f32.mrb[0].mxu0  ;;  %v402_v41 = vpop.f32.mrb[0].mxu1 }
 0x12e   : > { %v403_v42 = vadd.f32 %v402_v41, %v362_v40  ;;  %v627_v43 = vpop.f32.mrb[1].mxu0  ;;  %v647_v44 = vpop.f32.mrb[1].mxu1 }
 0x12f   : > { %v365_v46 = vpop.f32.mrb[2].mxu0  ;;  %v405_v47 = vpop.f32.mrb[2].mxu1 }
 0x130   : > { %v413_v48 = vadd.f32 %v411_v39, %v403_v42  ;;  %v628_v49 = vpop.f32.mrb[3].mxu0  ;;  %v648_v50 = vpop.f32.mrb[3].mxu1 }
 0x132   : > { %v431_v51 = vmul.f32 %v732_v45, %v413_v48  ;;  %415 = vrot.lane.b32.xlu1 %v413_v48, %s853_s13 }
 0x134   : > { %v432_v52 = vmul.f32 2.0, %v431_v51  ;;  %v439_v55 = vmul.f32 %v431_v51, %v431_v51  ;;  %v452_v63 = vrot.slane %v431_v51, %v451_v62 }
 0x136   : > { %v433_v53 = vmul.f32 %v432_v52, %v413_v48  ;;  %v441_v58 = vrot.slane %v439_v55, 7  ;;  %v453_v3 = vsub.f32 %v448_v1, %v452_v63 }
 0x138   : > { %v435_v54 = vrot.slane %v433_v53, 7 }
 0x13a   : > { %v437_v56 = vsub.f32 %v413_v48, %v435_v54 }
 0x13c   : > { %v438_v57 = vmul.f32 %v732_v45, %v437_v56 }
 0x13e   : > { %v443_v59 = vadd.f32 %v441_v58, %v438_v57 }
 0x140   : > { %v444_v60 = vadd.f32 1e-05, %v443_v59 }
 0x142   : > { %733 = vrsqrt.f32 %v444_v60 }
 0x14c   : > { %v734_v2 = vpop.eup %733 }
 0x14d   : > { %v457_v4 = vrot.slane %v734_v2, %v456_v0 }
 0x14f   : > { %v458_v5 = vmul.f32 %v457_v4, %v453_v3 }
 0x151   : > { %v464_v8 = vmul.f32 %v462_v6, %v458_v5 }
 0x153   : > { %v470_v9 = vadd.f32 %v468_v7, %v464_v8 }
 0x155   : > { %471 = vst [vmem:[%s225_s24] sm:$0xf] %v470_v9 }
 0x156   : > { %776 = shalt.err (!%p773_p6)
}
 0x157   : > { %s777_s10 = scalar_lea.hbm %s1015_s30, 64  ;;  %s781_s13 = scalar_lea.hbm %s1067_s4, 128 }
 0x158   : > { %p778_p7 = scmp.ne.s32.totalorder %s1015_s30, %s777_s10  ;;  %p782_p0 = scmp.lt.u32.totalorder %s1015_s30, %s1067_s4 }
 0x159   : > { %p783_p2 = scmp.lt.u32.totalorder %s781_s13, %s777_s10  ;;  %p785_p8 = scmp.lt.u32.totalorder %s777_s10, %s1015_s30 }
 0x15a   : > { %p779_p9 = pnand %p778_p7, %p1079_p10 }
 0x15b   : > { %p784_p4 = por %p783_p2, %p782_p0 }
 0x15c   : > { %p780_p12 = pneg %p779_p9 }
 0x15d   : > { %p786_p11 = por %p785_p8, %p784_p4 }
 0x15f   : > { %p787_p13 = pnand %p786_p11, %p780_p12 }
 0x161   : > { %790 = shalt.err (!%p787_p13)
}
 0x162   : > { %653 = dma.vmem_to_hbm [thread:$0]  (%p1079_p10), %s1017_s26, 64, %s1015_s30, %s473_s6  }
 0x1a4   : > { %v416_v10 = vpop.permute.xlu1 %415 }
 0x1a5   : > { %419 = vst.msk [vmem:[#allocation2] sm:$0x3] %vm238_vm0, %v416_v10 }
 0x1a6 PF: > { %p665_p1 = scmp.ge.s32.totalorder %s845_s20, 2  ;;  %s499_s22 = sand.u32 1, %s825_s15  }
 0x1a7   : > { %p1080_p3 = scmp.ne.s32.totalorder %s1073_s27, 0  ;;  %s500_s24 = scalar_lea.sflag [#allocation5], %s499_s22 }
 0x1a9   : > { %p660_p5 = pnand %p665_p1, %p1080_p3 }
 0x1ab   : > { %820 = dma.done.wait (!%p660_p5), %s500_s24, 64  }
 0x1ac   : > { %822 = vsyncadd (!%p660_p5), %s500_s24, 4294967232  ;;  %s18_s20 = sadd.s32 1, %s845_s20   ;;  %s1081_s15 = smov %s829_s16 }
 0x1ad   : > { %p15_p6 = scmp.ge.s32.totalorder %s18_s20, 4   ;;  %s1082_s16 = smov %s833_s17 }
 0x1ae   : > { %s1083_s17 = smov %s933_s28  ;;  %s1084_s18 = smov %s841_s19 }
 0x1af   : > { %s1085_s19 = smov %s1087_s23  ;;  %17 = sbr.rel (!%p15_p6) target bundleno = 5 (0x5), region = 80 }
 0x1b6   :  { %505 = vsyncpa [#allocation4], 1 }
 0x1b7   :  { %507 = vsyncpa [#allocation4 + $0x1], 1 }
 0x1b8   :  { %508 = vsyncpa [#allocation5], 1 }
 0x1b9   :  { %510 = vsyncpa [#allocation5 + $0x1], 1 }

</bundles_post_ra>
